<compile_context>
chip_gen: v5e
topology: v5e:2x2
jax: 0.10.0
libtpu: 0.0.40
codegen_flags: <defaults>
</compile_context>

<pallas_src>
import numpy as np
import jax
import jax.numpy as jnp
from jax.experimental import pallas as pl
from jax.experimental.pallas import tpu as pltpu


# Per-block (input + output) byte budget.  Double-buffering doubles it, so this
# keeps peak VMEM well under v7x's 32 MiB scoped default (and far under
# v5e/v6e's 128 MiB).
_BLOCK_BUDGET_BYTES = 4 * 1024 * 1024


# --------------------------------------------------------------------------
# Static patch bookkeeping (pure Python, mirrors shuffle_weight exactly).
# --------------------------------------------------------------------------
def _patch_slices(dim_size, factor):
    """(start, width) slices replicating shuffle_weight's patch extraction,
    including the `if i != factor - 1` test on the already-scaled index."""
    tw = dim_size // factor
    slices = []
    for k in range(factor):
        i = k * tw
        if i != factor - 1:
            slices.append((i, tw))
        else:
            slices.append((i, dim_size - i))
    return slices


def _is_contiguous_prefix(slices):
    pos = 0
    for start, width in slices:
        if start != pos or width <= 0:
            return False
        pos += width
    return True


def _pick_row_tile(nrows, bytes_per_row, budget=_BLOCK_BUDGET_BYTES):
    """Largest multiple-of-8 divisor of `nrows` whose block fits `budget`.

    Prefers an even block count (so v7x's two TensorCores get equal work) as
    long as that does not shrink the tile below half of the largest fit.
    Returns None when no multiple-of-8 divisor fits; caller then uses a single
    whole-array block (full-dim blocks are exempt from the (8,128) rule).
    """
    cands = [d for d in range(8, nrows + 1, 8)
             if nrows % d == 0 and d * bytes_per_row <= budget]
    if not cands:
        return None
    cands.sort(reverse=True)
    best = cands[0]
    for d in cands:
        if (nrows // d) % 2 == 0 and 2 * d >= best:
            return d
    return best


# --------------------------------------------------------------------------
# Kernels
# --------------------------------------------------------------------------
def _copy_kernel(x_ref, o_ref):
    o_ref[...] = x_ref[...]


def _make_w_crop_kernel(w_out):
    # Input block already contains only the surviving rows; crop W here.
    def kernel(x_ref, o_ref):
        o_ref[...] = x_ref[:, :, :w_out]
    return kernel


def _make_hw_crop_kernel(h_out, w_out):
    def kernel(x_ref, o_ref):
        o_ref[...] = x_ref[:, :h_out, :w_out]
    return kernel


def _make_gather_kernel(row_slices, col_slices, w_out):
    """Pathological branch (k*tw == factor-1): overlapping / non-prefix patches.

    Per review: no full-size concatenate intermediates for the row axis — each
    row patch is stored directly into its static sub-window of out_ref with
    full lane width (lane-dense stores).  When the column patches are a
    contiguous prefix the lane gather is a single static slice.
    """
    col_prefix = _is_contiguous_prefix(col_slices)

    def kernel(x_ref, o_ref):
        x = x_ref[...]                                        # (C, H, W)
        if col_prefix:
            cols = x[:, :, :w_out]                            # (C, H, W_out)
        else:
            # TODO(synk): unaligned lane-dim concatenate; rare pathological
            # sub-branch kept for exactness (columns overlap).
            cols = jnp.concatenate(
                [x[:, :, c0:c0 + cw] for c0, cw in col_slices], axis=-1)
        dst = 0
        for r0, rh in row_slices:
            o_ref[:, dst:dst + rh, :] = cols[:, r0:r0 + rh, :]
            dst += rh
    return kernel


# --------------------------------------------------------------------------
# pallas_call wrappers
# --------------------------------------------------------------------------
def _lane_dense_copy(img):
    """Identity copy through a lane-dense 2D slab (last dim a large multiple
    of 128 so stores are unmasked), tiled along rows in >= 8-row blocks."""
    C, H, W = img.shape
    total = C * H * W
    itemsize = jnp.dtype(img.dtype).itemsize

    lanes = None
    for cand in (2048, 1024, 512, 256, 128):
        if total % cand == 0:
            lanes = cand
            break
    if lanes is None:
        lanes = W                         # fallback: (C*H, W); W == full dim
    rows = total // lanes
    x2d = img.reshape(rows, lanes)

    tile = _pick_row_tile(rows, 2 * lanes * itemsize)
    if tile is None:
        tile = rows                       # single whole-array block
    grid = (rows // tile,)

    cost = pl.CostEstimate(flops=0, transcendentals=0,
                           bytes_accessed=2 * total * itemsize)
    out2d = pl.pallas_call(
        _copy_kernel,
        out_shape=jax.ShapeDtypeStruct((rows, lanes), img.dtype),
        grid=grid,
        in_specs=[pl.BlockSpec((tile, lanes), lambda r: (r, 0))],
        out_specs=pl.BlockSpec((tile, lanes), lambda r: (r, 0)),
        compiler_params=pltpu.CompilerParams(dimension_semantics=("parallel",)),
        cost_estimate=cost,
    )(x2d)
    return out2d.reshape(C, H, W)


def _prefix_crop(img, h_out, w_out):
    """Contiguous prefix crop: out = img[:, :h_out, :w_out]."""
    C, H, W = img.shape
    itemsize = jnp.dtype(img.dtype).itemsize

    tile = None
    if h_out % 8 == 0:
        # Only DMA the h_out rows that survive the crop; crop W in-kernel.
        tile = _pick_row_tile(h_out, C * (W + w_out) * itemsize)

    if tile is not None:
        grid = (h_out // tile,)
        cost = pl.CostEstimate(
            flops=0, transcendentals=0,
            bytes_accessed=C * h_out * (W + w_out) * itemsize)
        return pl.pallas_call(
            _make_w_crop_kernel(w_out),
            out_shape=jax.ShapeDtypeStruct((C, h_out, w_out), img.dtype),
            grid=grid,
            in_specs=[pl.BlockSpec((C, tile, W), lambda r: (0, r, 0))],
            out_specs=pl.BlockSpec((C, tile, w_out), lambda r: (0, r, 0)),
            compiler_params=pltpu.CompilerParams(
                dimension_semantics=("parallel",)),
            cost_estimate=cost,
        )(img)

    # Fallback: single whole-tensor block (full-dim blocks satisfy (8,128)).
    cost = pl.CostEstimate(
        flops=0, transcendentals=0,
        bytes_accessed=(C * H * W + C * h_out * w_out) * itemsize)
    return pl.pallas_call(
        _make_hw_crop_kernel(h_out, w_out),
        out_shape=jax.ShapeDtypeStruct((C, h_out, w_out), img.dtype),
        grid=(1,),
        in_specs=[pl.BlockSpec((C, H, W), lambda i: (0, 0, 0))],
        out_specs=pl.BlockSpec((C, h_out, w_out), lambda i: (0, 0, 0)),
        compiler_params=pltpu.CompilerParams(dimension_semantics=("arbitrary",)),
        cost_estimate=cost,
    )(img)


def _gather(img, row_slices, col_slices, h_out, w_out):
    C, H, W = img.shape
    itemsize = jnp.dtype(img.dtype).itemsize
    cost = pl.CostEstimate(
        flops=0, transcendentals=0,
        bytes_accessed=(C * H * W + C * h_out * w_out) * itemsize)
    return pl.pallas_call(
        _make_gather_kernel(row_slices, col_slices, w_out),
        out_shape=jax.ShapeDtypeStruct((C, h_out, w_out), img.dtype),
        grid=(1,),
        in_specs=[pl.BlockSpec((C, H, W), lambda i: (0, 0, 0))],
        out_specs=pl.BlockSpec((C, h_out, w_out), lambda i: (0, 0, 0)),
        compiler_params=pltpu.CompilerParams(dimension_semantics=("arbitrary",)),
        cost_estimate=cost,
    )(img)


# --------------------------------------------------------------------------
# Public wrapper (mirrors ShufflePatchesWithIndex.forward)
# --------------------------------------------------------------------------
def shuffle_patches_with_index(img, factor, indices=None, key=None,
                               force_copy=False):
    """JAX/Pallas equivalent of ShufflePatchesWithIndex(factor)(img, indices).

    img: (C, H, W).  Returns (out, indices) like the PyTorch module.
    force_copy=True runs the identity case through the lane-dense copy kernel
    instead of the zero-copy short circuit.
    """
    C, H, W = img.shape
    if H < factor or W < factor:
        raise ValueError(
            f"spatial dims ({H}, {W}) must be >= factor ({factor}); the "
            "original module would produce zero-width patches here.")

    col_slices = _patch_slices(W, factor)   # first shuffle_weight: along W
    row_slices = _patch_slices(H, factor)   # second (after permute): along H
    W_out = sum(cw for _, cw in col_slices)
    H_out = sum(rh for _, rh in row_slices)
    crop_ok = (_is_contiguous_prefix(col_slices)
               and _is_contiguous_prefix(row_slices))

    if crop_ok and H_out == H and W_out == W:
        # Bit-exact identity: skip the HBM read+write round trip entirely.
        out = _lane_dense_copy(img) if force_copy else img
    elif crop_ok:
        out = _prefix_crop(img, H_out, W_out)
    else:
        out = _gather(img, row_slices, col_slices, H_out, W_out)

    # --- indices bookkeeping (glue, mirrors forward()'s try/except) --------
    # NOTE: evaluated eagerly; under jit a traced `indices` concretization-
    # errors and falls into the except branch (same caveat as .cpu().tolist()).
    try:
        reference = bool(np.asarray(indices).any())
    except Exception:
        reference = False

    if not reference:
        if key is None:
            key = jax.random.PRNGKey(0)
        k1, k2 = jax.random.split(key)
        indices1 = jax.random.permutation(k1, factor)
        indices2 = jax.random.permutation(k2, factor)
        # TODO(synk): torch returns LongTensor (int64); we keep int32.
        indices = jnp.stack([indices1, indices2], 0).astype(jnp.int32)
        return out, indices
    else:
        return out, indices


# --------------------------------------------------------------------------
# Self-test
# --------------------------------------------------------------------------
if __name__ == "__main__":
    key = jax.random.PRNGKey(0)
    k_img, k_perm, k_img2, k_img3 = jax.random.split(key, 4)

    # ---- Case 1: divisible dims -> identity; force the lane-dense copy -----
    C, H, W = 4, 16, 16
    factor = 2
    img = jax.random.normal(k_img, (C, H, W), dtype=jnp.float32)

    out1, idx1 = shuffle_patches_with_index(img, factor, indices=None,
                                            key=k_perm, force_copy=True)
    out1 = jax.block_until_ready(out1)
    idx1 = jax.block_until_ready(idx1)
    assert out1.shape == (C, H, W)
    assert idx1.shape == (2, factor)
    np.testing.assert_allclose(np.asarray(out1), np.asarray(img), rtol=0, atol=0)

    # ---- Case 1b: default zero-copy short circuit ---------------------------
    out1b, _ = shuffle_patches_with_index(img, factor, indices=None, key=k_perm)
    np.testing.assert_allclose(np.asarray(out1b), np.asarray(img), rtol=0, atol=0)

    # ---- Case 2: indices supplied -> same pixels, indices pass through ------
    given = jnp.array([[1, 0], [0, 1]], dtype=jnp.int32)
    out2, idx2 = shuffle_patches_with_index(img, factor, indices=given,
                                            force_copy=True)
    out2 = jax.block_until_ready(out2)
    np.testing.assert_allclose(np.asarray(out2), np.asarray(img), rtol=0, atol=0)
    np.testing.assert_array_equal(np.asarray(idx2), np.asarray(given))

    # ---- Case 3: non-divisible dims -> genuine crop (tiled, read H_out only)
    C3, H3, W3, f3 = 3, 18, 18, 4
    img3 = jax.random.normal(k_img2, (C3, H3, W3), dtype=jnp.float32)
    out3, _ = shuffle_patches_with_index(img3, f3, indices=None, key=k_perm)
    out3 = jax.block_until_ready(out3)
    ref3 = np.asarray(img3)[:, :f3 * (H3 // f3), :f3 * (W3 // f3)]
    assert out3.shape == ref3.shape
    np.testing.assert_allclose(np.asarray(out3), ref3, rtol=0, atol=0)

    # ---- Case 4: pathological branch (k*tw == factor-1 along H) -> gather ---
    C4, H4, W4, f4 = 4, 8, 12, 3
    img4 = jax.random.normal(k_img3, (C4, H4, W4), dtype=jnp.float32)
    out4, _ = shuffle_patches_with_index(img4, f4, indices=None, key=k_perm)
    out4 = jax.block_until_ready(out4)
    x4 = np.asarray(img4)
    cs4 = _patch_slices(W4, f4)
    rs4 = _patch_slices(H4, f4)
    ref4 = np.concatenate([x4[:, :, c0:c0 + cw] for c0, cw in cs4], axis=-1)
    ref4 = np.concatenate([ref4[:, r0:r0 + rh, :] for r0, rh in rs4], axis=1)
    assert out4.shape == ref4.shape
    np.testing.assert_allclose(np.asarray(out4), ref4, rtol=0, atol=0)

    print("KERNEL_OK")
</pallas_src>

<mosaic_0001>
module attributes {stable_mosaic.version = 11 : i64} {
  func.func @_copy_kernel(%arg0: i32, %arg1: memref<1x1024xf32, #tpu.memory_space<vmem>>, %arg2: memref<1x1024xf32, #tpu.memory_space<vmem>>) attributes {dimension_semantics = [#tpu.dimension_semantics<parallel>], iteration_bounds = array<i64: 1>, scalar_prefetch = 0 : i64, scratch_operands = 0 : i64, tpu.core_type = #tpu.core_type<tc>, window_params = [{transform_indices = @transform_0, window_bounds = array<i64: 1, 1024>}, {transform_indices = @transform_1, window_bounds = array<i64: 1, 1024>}]} {
    %c0 = arith.constant 0 : index
    %c0_0 = arith.constant 0 : index
    %0 = vector.load %arg1[%c0, %c0_0] : memref<1x1024xf32, #tpu.memory_space<vmem>>, vector<1x1024xf32>
    %c0_1 = arith.constant 0 : index
    %c0_2 = arith.constant 0 : index
    %1 = vector.load %arg2[%c0_1, %c0_2] : memref<1x1024xf32, #tpu.memory_space<vmem>>, vector<1x1024xf32>
    tpu.vector_store %arg2[%c0_1, %c0_2], %0 {strides = array<i32>} : memref<1x1024xf32, #tpu.memory_space<vmem>>, vector<1x1024xf32>,
    return
  }
  func.func @transform_0(%arg0: i32) -> (i32, i32) {
    %c0_i32 = arith.constant 0 : i32
    %c0_i32_0 = arith.constant 0 : i32
    return %arg0, %c0_i32 : i32, i32
  }
  func.func @transform_1(%arg0: i32) -> (i32, i32) {
    %c0_i32 = arith.constant 0 : i32
    %c0_i32_0 = arith.constant 0 : i32
    return %arg0, %c0_i32 : i32, i32
  }
}

</mosaic_0001>

<bundles_post_ra>
// kernel: tpu_custom_call.1
= control target key start
LH: loop header
LB: loop body
LE: loop exit
PB: predicated region body
PF: predicated region fallthrough
CT: control target
= control target key end

     0   :  { %6 = vsyncpa [#allocation3], 0  ;;  %s114_s0 = inlined_call_operand.hbm [shape: f32[1,1024], index: 0, kind: input, shape index: {}]   ;;  %s115_s1 = inlined_call_operand.hbm [shape: f32[1,1024], index: 1, kind: output, shape index: {}]  }
   0x1   :  { %7 = vsyncpa [#allocation4], 0  ;;  %s13_s8 = sshll.u32 %s114_s0, 4  ;;  %s96_s9 = smov [#allocation2]   ;;  %s14_s8 = int_to_ptr.hbm [resolvable:$true] %s13_s8 }
   0x2   :  { %s15_s10 = sshll.u32 %s96_s9, 4  ;;  %s16_s10 = int_to_ptr.vmem [resolvable:$true] %s15_s10 }
   0x3   :  { %18 = dma.hbm_to_vmem [thread:$0]  %s14_s8, 128, %s16_s10, [#allocation3]  }
   0x4   :  { %92 = dma.done.wait [#allocation3], 128  }
   0x5   :  { %93 = vsyncadd [#allocation3], 4294967168  ;;  %s97_s11 = smov [#allocation5]   ;;  %s32_s15 = sshll.u32 %s115_s1, 4  ;;  %v23_v0 = vld [vmem:[#allocation2] sm:$0xff]  ;;  %s33_s15 = int_to_ptr.hbm [resolvable:$true] %s32_s15 }
   0x6   :  { %s30_s12 = sshll.u32 %s97_s11, 4  ;;  %24 = vst [vmem:[#allocation5] sm:$0xff] %v23_v0  ;;  %s31_s12 = int_to_ptr.vmem [resolvable:$true] %s30_s12 }
   0x7   :  { %35 = dma.vmem_to_hbm [thread:$0]  %s31_s12, 128, %s33_s15, [#allocation4]  }
   0x8   :  { %94 = dma.done.wait [#allocation4], 128  }
   0x9   :  { %95 = vsyncadd [#allocation4], 4294967168 }
   0xa   :  { %40 = vsyncpa [#allocation3], 1 }
   0xb   :  { %41 = vsyncpa [#allocation4], 1 }

</bundles_post_ra>
